<compile_context>
chip_gen: v7x
topology: tpu7x:2x2x1
jax: 0.10.0
libtpu: 0.0.40
codegen_flags: <defaults>
</compile_context>

<pallas_src>
import numpy as np
import jax
import jax.numpy as jnp
from jax.experimental import pallas as pl
from jax.experimental.pallas import tpu as pltpu


# ----------------------------------------------------------------------------
# Host-side construction of the folded resampling matrices.
# ----------------------------------------------------------------------------
def _gaussian_1d(scale):
    """1D normalized Gaussian taps exactly as AntiAliasInterpolation2d.__init__."""
    sigma = (1.0 / scale - 1.0) / 2.0
    ksize = 2 * round(sigma * 4) + 1
    ka = ksize // 2
    kb = ka - 1 if ksize % 2 == 0 else ka
    grid = np.arange(ksize, dtype=np.float64)
    mean = (ksize - 1) / 2.0
    g = np.exp(-((grid - mean) ** 2) / (2.0 * sigma ** 2))
    g = g / g.sum()  # outer(g,g)/sum == outer(g/sum, g/sum): exactly separable
    return g, ksize, ka, kb


def _blur_matrix(size, g, ka):
    """'Same' 1D convolution matrix with zero padding folded in (size x size)."""
    K = g.shape[0]
    M = np.zeros((size, size), dtype=np.float64)
    for h in range(size):
        for a in range(K):
            s = h + a - ka
            if 0 <= s < size:
                M[h, s] += g[a]
    return M


def _bilinear_matrix(in_size, out_size):
    """align_corners=True bilinear resampling matrix, (out_size, in_size)."""
    M = np.zeros((out_size, in_size), dtype=np.float64)
    if out_size == 1:
        M[0, 0] = 1.0
        return M
    for o in range(out_size):
        src = o * (in_size - 1) / (out_size - 1)
        i0 = min(int(np.floor(src)), in_size - 1)
        i1 = min(i0 + 1, in_size - 1)
        frac = src - i0
        M[o, i0] += 1.0 - frac
        M[o, i1] += frac
    return M


def _folded_matrices(H, W, scale):
    """A (Ho,H), B (W,Wo) such that output_plane = A @ x_plane @ B."""
    g, _, ka, _ = _gaussian_1d(scale)
    Ho = int(np.floor(H * scale))
    Wo = int(np.floor(W * scale))
    A = _bilinear_matrix(H, Ho) @ _blur_matrix(H, g, ka)        # (Ho, H)
    B = (_bilinear_matrix(W, Wo) @ _blur_matrix(W, g, ka)).T    # (W, Wo)
    return A.astype(np.float32), B.astype(np.float32), Ho, Wo


def _pick_c_blk(C, H, W, Ho, Wo, budget_bytes=8 * 1024 * 1024):
    """Largest channel block dividing C that fits double-buffered in VMEM budget."""
    best = 1
    for cb in range(1, C + 1):
        if C % cb:
            continue
        need = 4 * (2 * cb * H * W + 2 * cb * Ho * Wo + 2 * (Ho * H + W * Wo))
        if need <= budget_bytes:
            best = cb
    return best


# ----------------------------------------------------------------------------
# Pallas kernel: per grid step, one (n, channel-block):  out = A @ x @ B
# ----------------------------------------------------------------------------
def _aa_kernel(x_ref, a_ref, b_ref, o_ref):
    x = x_ref[0]                                   # (C_blk, H, W)
    a = a_ref[...]                                 # (Ho, H)
    b = b_ref[...]                                 # (W, Wo)
    cb = x.shape[0]

    # Row resample+blur:  (C_blk, Ho, H) @ (C_blk, H, W) -> (C_blk, Ho, W)
    a_b = jnp.broadcast_to(a[None], (cb,) + a.shape)
    t = jnp.einsum('cij,cjk->cik', a_b, x, preferred_element_type=jnp.float32)

    # Column resample+blur: (C_blk, Ho, W) @ (C_blk, W, Wo) -> (C_blk, Ho, Wo)
    b_b = jnp.broadcast_to(b[None], (cb,) + b.shape)
    y = jnp.einsum('cij,cjk->cik', t, b_b, preferred_element_type=jnp.float32)

    o_ref[0] = y.astype(o_ref.dtype)


def anti_alias_interpolation2d(x, channels, scale):
    """Forward pass of AntiAliasInterpolation2d. x: (N, C, H, W)."""
    if scale == 1.0:
        return x
    N, C, H, W = x.shape
    assert C == channels

    A, B, Ho, Wo = _folded_matrices(H, W, scale)
    c_blk = _pick_c_blk(C, H, W, Ho, Wo)
    grid = (N, C // c_blk)

    out = pl.pallas_call(
        _aa_kernel,
        out_shape=jax.ShapeDtypeStruct((N, C, Ho, Wo), x.dtype),
        grid=grid,
        in_specs=[
            pl.BlockSpec((1, c_blk, H, W), lambda n, c: (n, c, 0, 0)),
            pl.BlockSpec((Ho, H), lambda n, c: (0, 0)),   # folded row matrix
            pl.BlockSpec((W, Wo), lambda n, c: (0, 0)),   # folded col matrix
        ],
        out_specs=pl.BlockSpec((1, c_blk, Ho, Wo), lambda n, c: (n, c, 0, 0)),
        compiler_params=pltpu.CompilerParams(
            dimension_semantics=("parallel", "parallel")),
    )(x, jnp.asarray(A), jnp.asarray(B))
    return out


def image_pyramide(x, scales, num_channels):
    """Forward pass of ImagePyramide: dict of anti-aliased downsampled images."""
    out_dict = {}
    for scale in scales:
        key = str(scale).replace('.', '-')
        out_dict['prediction_' + key.replace('-', '.')] = anti_alias_interpolation2d(
            x, num_channels, scale)
    return out_dict


# ----------------------------------------------------------------------------
# Independent (un-folded) numpy reference: pad -> depthwise conv -> bilinear.
# ----------------------------------------------------------------------------
def _reference_numpy(x_np, channels, scale):
    if scale == 1.0:
        return x_np
    N, C, H, W = x_np.shape
    g, K, ka, kb = _gaussian_1d(scale)
    k2d = np.outer(g, g)
    k2d = k2d / k2d.sum()
    Ho = int(np.floor(H * scale))
    Wo = int(np.floor(W * scale))
    xp = np.pad(x_np, ((0, 0), (0, 0), (ka, kb), (ka, kb)))
    blurred = np.zeros((N, C, H, W), np.float64)
    for a in range(K):
        for b in range(K):
            blurred += k2d[a, b] * xp[:, :, a:a + H, b:b + W]
    Wh = _bilinear_matrix(H, Ho)
    Ww = _bilinear_matrix(W, Wo)
    return np.einsum('oh,nchw,pw->ncop', Wh, blurred, Ww)


if __name__ == "__main__":
    key = jax.random.PRNGKey(0)
    N, C, H, W = 2, 4, 16, 16
    scales = [1, 0.5, 0.25]

    x = jax.random.normal(key, (N, C, H, W), dtype=jnp.float32)

    pyr = image_pyramide(x, scales, C)
    pyr = jax.block_until_ready(pyr)

    x_np = np.asarray(x, dtype=np.float64)
    for scale in scales:
        k = 'prediction_' + str(scale).replace('.', '-').replace('-', '.')
        ref = _reference_numpy(x_np, C, scale)
        got = np.asarray(pyr[k])
        assert got.shape == ref.shape, (scale, got.shape, ref.shape)
        np.testing.assert_allclose(got, ref, atol=2e-4, rtol=2e-4)

    print("KERNEL_OK")
</pallas_src>

<mosaic_0001>
module attributes {stable_mosaic.version = 11 : i64} {
  func.func @_aa_kernel(%arg0: i32, %arg1: i32, %arg2: memref<1x4x16x16xf32, #tpu.memory_space<vmem>>, %arg3: memref<8x16xf32, #tpu.memory_space<vmem>>, %arg4: memref<16x8xf32, #tpu.memory_space<vmem>>, %arg5: memref<1x4x8x8xf32, #tpu.memory_space<vmem>>) attributes {dimension_semantics = [#tpu.dimension_semantics<parallel>, #tpu.dimension_semantics<parallel>], iteration_bounds = array<i64: 2, 1>, scalar_prefetch = 0 : i64, scratch_operands = 0 : i64, tpu.core_type = #tpu.core_type<tc>, window_params = [{transform_indices = @transform_0, window_bounds = array<i64: 1, 4, 16, 16>}, {pipeline_mode = #tpu.pipeline_mode<synchronous>, transform_indices = @transform_1, window_bounds = array<i64: 8, 16>}, {pipeline_mode = #tpu.pipeline_mode<synchronous>, transform_indices = @transform_2, window_bounds = array<i64: 16, 8>}, {transform_indices = @transform_3, window_bounds = array<i64: 1, 4, 8, 8>}]} {
    %c0 = arith.constant 0 : index
    %c0_0 = arith.constant 0 : index
    %c0_1 = arith.constant 0 : index
    %c0_2 = arith.constant 0 : index
    %0 = vector.load %arg2[%c0, %c0_0, %c0_1, %c0_2] : memref<1x4x16x16xf32, #tpu.memory_space<vmem>>, vector<1x4x16x16xf32>
    %1 = vector.shape_cast %0 : vector<1x4x16x16xf32> to vector<4x16x16xf32>
    %c0_3 = arith.constant 0 : index
    %c0_4 = arith.constant 0 : index
    %2 = vector.load %arg3[%c0_3, %c0_4] : memref<8x16xf32, #tpu.memory_space<vmem>>, vector<8x16xf32>
    %c0_5 = arith.constant 0 : index
    %c0_6 = arith.constant 0 : index
    %3 = vector.load %arg4[%c0_5, %c0_6] : memref<16x8xf32, #tpu.memory_space<vmem>>, vector<16x8xf32>
    %4 = vector.shape_cast %2 : vector<8x16xf32> to vector<1x8x16xf32>
    %5 = vector.shape_cast %4 : vector<1x8x16xf32> to vector<1x8x16xf32>
    %6 = vector.broadcast %5 : vector<1x8x16xf32> to vector<4x8x16xf32>
    "tpu.trace_start"() <{level = 10 : i32, message = "cij,cjk->cik"}> : () -> ()
    %cst = arith.constant dense<0.000000e+00> : vector<4x8x16xf32>
    %7 = tpu.matmul %6, %1, %cst {dimension_numbers = #tpu.dot_dimension_numbers<[2], [1], [1], [2], [0, 0, 0, 1, 1, 2], [0], [0]>} : vector<4x8x16xf32>, vector<4x16x16xf32>, vector<4x8x16xf32> -> vector<4x8x16xf32>
    "tpu.trace_stop"() : () -> ()
    %8 = vector.shape_cast %3 : vector<16x8xf32> to vector<1x16x8xf32>
    %9 = vector.shape_cast %8 : vector<1x16x8xf32> to vector<1x16x8xf32>
    %10 = vector.broadcast %9 : vector<1x16x8xf32> to vector<4x16x8xf32>
    "tpu.trace_start"() <{level = 10 : i32, message = "cij,cjk->cik"}> : () -> ()
    %cst_7 = arith.constant dense<0.000000e+00> : vector<4x8x8xf32>
    %11 = tpu.matmul %7, %10, %cst_7 {dimension_numbers = #tpu.dot_dimension_numbers<[2], [1], [1], [2], [0, 0, 0, 1, 1, 2], [0], [0]>} : vector<4x8x16xf32>, vector<4x16x8xf32>, vector<4x8x8xf32> -> vector<4x8x8xf32>
    "tpu.trace_stop"() : () -> ()
    %c0_8 = arith.constant 0 : index
    %c0_9 = arith.constant 0 : index
    %c0_10 = arith.constant 0 : index
    %c0_11 = arith.constant 0 : index
    %12 = vector.load %arg5[%c0_8, %c0_9, %c0_10, %c0_11] : memref<1x4x8x8xf32, #tpu.memory_space<vmem>>, vector<1x4x8x8xf32>
    %13 = vector.shape_cast %12 : vector<1x4x8x8xf32> to vector<4x8x8xf32>
    %14 = vector.shape_cast %11 : vector<4x8x8xf32> to vector<1x4x8x8xf32>
    tpu.vector_store %arg5[%c0_8, %c0_9, %c0_10, %c0_11], %14 {strides = array<i32>} : memref<1x4x8x8xf32, #tpu.memory_space<vmem>>, vector<1x4x8x8xf32>,
    return
  }
  func.func @transform_0(%arg0: i32, %arg1: i32) -> (i32, i32, i32, i32) {
    %c0_i32 = arith.constant 0 : i32
    %c0_i32_0 = arith.constant 0 : i32
    %c0_i32_1 = arith.constant 0 : i32
    return %arg0, %arg1, %c0_i32, %c0_i32_0 : i32, i32, i32, i32
  }
  func.func @transform_1(%arg0: i32, %arg1: i32) -> (i32, i32) {
    %c0_i32 = arith.constant 0 : i32
    %c0_i32_0 = arith.constant 0 : i32
    %c0_i32_1 = arith.constant 0 : i32
    return %c0_i32, %c0_i32_0 : i32, i32
  }
  func.func @transform_2(%arg0: i32, %arg1: i32) -> (i32, i32) {
    %c0_i32 = arith.constant 0 : i32
    %c0_i32_0 = arith.constant 0 : i32
    %c0_i32_1 = arith.constant 0 : i32
    return %c0_i32, %c0_i32_0 : i32, i32
  }
  func.func @transform_3(%arg0: i32, %arg1: i32) -> (i32, i32, i32, i32) {
    %c0_i32 = arith.constant 0 : i32
    %c0_i32_0 = arith.constant 0 : i32
    %c0_i32_1 = arith.constant 0 : i32
    return %arg0, %arg1, %c0_i32, %c0_i32_0 : i32, i32, i32, i32
  }
}

</mosaic_0001>

<bundles_post_ra>
// kernel: tpu_custom_call.1
= control target key start
LH: loop header
LB: loop body
LE: loop exit
PB: predicated region body
PF: predicated region fallthrough
CT: control target
= control target key end

     0   :  { %8 = vsyncpa [#allocation3], 0  ;;  %s1451_s0 = inlined_call_operand.hbm [shape: f32[2,4,16,16], index: 0, kind: input, shape index: {}]   ;;  %s1452_s1 = inlined_call_operand.vmem [shape: f32[8,16], index: 1, kind: input, shape index: {}]   ;;  %s1453_s2 = inlined_call_operand.vmem [shape: f32[16,8], index: 2, kind: input, shape index: {}]   ;;  %s1454_s3 = inlined_call_operand.hbm [shape: f32[2,4,8,8], index: 3, kind: output, shape index: {}]  }
   0x1   :  { %10 = vsyncpa [#allocation3 + $0x1], 0 }
   0x2   :  { %11 = vsyncpa [#allocation4], 0 }
   0x3   :  { %13 = vsyncpa [#allocation4 + $0x1], 0  ;;  %s1246_s12 = smov 0   ;;  %s1248_s13 = smov 0  }
   0x4   :  { %s1250_s14 = smov 0   ;;  %s1252_s15 = smov 0  }
   0x5   :  { %s1254_s16 = smov 0   ;;  %s1256_s17 = smov 0  }
   0x6 LB: > { %s905_s18 = sadd.s32 4294967295, %s1215_s17   ;;  %s906_s19 = sadd.s32 4294967294, %s1215_s17   ;;  %s1215_s17 = sphi %s1256_s17, %s19_s17   ;;  %s1211_s16 = sphi %s1254_s16, %s1469_s16   ;;  %s1207_s15 = sphi %s1252_s15, %s1468_s15   ;;  %s1203_s14 = sphi %s1250_s14, %s1467_s14   ;;  %s1199_s13 = sphi %s1248_s13, %s1466_s13   ;;  %s1195_s12 = sphi %s1246_s12, %s1465_s12  }
   0x7   : > { %s31_s20 = sadd.s32 1, %s1211_s16  ;;  %s40_s21 = sadd.s32 1, %s1203_s14 }
   0x8   : > { %p33_p0 = scmp.ge.s32.totalorder %s31_s20, 2  ;;  %p47_p1 = scmp.ne.s32.totalorder %s1203_s14, %s1199_s13 }
   0x9   : > { %p48_p2 = scmp.eq.s32.totalorder %s1215_s17, 0  ;;  %p53_p3 = scmp.ne.s32.totalorder %s1199_s13, %s1195_s12 }
   0xa   : > { %s1471_s20 = smov (%p33_p0, %s31_s20), 0  ;;  %p54_p5 = scmp.eq.s32.totalorder %s905_s18, 0 }
   0xb   : > { %p1287_p4 = por %p48_p2, %p47_p1  ;;  %s35_s23 = ssub.s32 %s1211_s16, %s1471_s20 }
   0xc   : > { %p121_p6 = scmp.eq.s32.totalorder %s905_s18, 1  ;;  %p38_p7 = scmp.eq.s32.totalorder %s35_s23, 0 }
   0xd   : > { %p1293_p8 = por %p54_p5, %p53_p3  ;;  %p127_p10 = scmp.eq.s32.totalorder %s906_s19, 1 }
   0xe   : > { %p1297_p9 = por %p121_p6, %p47_p1  ;;  %p1046_p13 = scmp.lt.s32.totalorder %s1215_s17, 2 }
   0xf   : > { %s1302_s26 = scalar_select %p38_p7, %s1203_s14, %s40_s21  }
  0x10   : > { %s1458_s25 = scalar_select %p1297_p9, 1, 0 }
  0x11   : > { %p1304_p11 = por %p127_p10, %p53_p3  ;;  %s153_s28 = sand.u32 1, %s1203_s14  }
  0x12   : > { %s909_s29 = sshll.u32 %s153_s28, 6  ;;  %s928_s30 = sshll.u32 %s1211_s16, 10 }
  0x13   : > { %s1459_s27 = scalar_select %p1304_p11, 1, 0 }
  0x14   : > { %s1315_s6 = scalar_lea.hbm %s1451_s0, %s928_s30  ;;  %s157_s7 = scalar_lea.vmem [#allocation2], %s909_s29 }
  0x15   : > { %s167_s8 = sshll.u32 %s157_s7, 4  ;;  %p1321_p0 = pnand %p1046_p13, %p1287_p4  ;;  %s1317_s8 = int_to_ptr.vmem [resolvable:$true] %s167_s8 }
  0x16   : > { %s1326_s10 = scalar_lea.sflag [#allocation3], %s153_s28  ;;  %s1103_s11 = scalar_lea.hbm %s1315_s6, 1024 }
  0x17   : > { %p1104_p2 = scmp.ne.s32.totalorder %s1315_s6, %s1103_s11  ;;  %p1105_p3 = pneg %p1321_p0 }
  0x18   : > { %s1108_s21 = scalar_lea.hbm %s1451_s0, 2048  ;;  %p1109_p4 = scmp.lt.u32.totalorder %s1315_s6, %s1451_s0 }
  0x19   : > { %p1106_p5 = pnand %p1105_p3, %p1104_p2  ;;  %p1110_p7 = scmp.lt.u32.totalorder %s1108_s21, %s1103_s11 }
  0x1a   : > { %p1112_p13 = scmp.lt.u32.totalorder %s1103_s11, %s1315_s6 }
  0x1b   : > { %p1107_p6 = pneg %p1106_p5  ;;  %p1111_p10 = por %p1110_p7, %p1109_p4 }
  0x1d   : > { %p1113_p12 = por %p1112_p13, %p1111_p10 }
  0x1f   : > { %p1114_p1 = pnand %p1113_p12, %p1107_p6 }
  0x21   : > { %1117 = shalt.err (!%p1114_p1)
}
  0x22   : > { %s1118_s28 = scalar_lea.vmem %s1317_s8, 1024  ;;  %s1217_s29 = smov [#allocation2]  }
  0x23   : > { %p1119_p2 = scmp.ne.s32.totalorder %s1317_s8, %s1118_s28  ;;  %s1123_s30 = sshll.u32 %s1217_s29, 4  ;;  %s1124_s30 = int_to_ptr.vmem [resolvable:$false] %s1123_s30 }
  0x24   : > { %s1125_s4 = scalar_lea.vmem %s1124_s30, 2048  ;;  %p1126_p9 = scmp.lt.s32.totalorder %s1317_s8, %s1124_s30 }
  0x25   : > { %p1121_p5 = pnand %p1119_p2, %p1105_p3  ;;  %p1127_p4 = scmp.lt.s32.totalorder %s1125_s4, %s1118_s28 }
  0x27   : > { %p1122_p11 = pneg %p1121_p5  ;;  %p1128_p7 = por %p1127_p4, %p1126_p9 }
  0x29   : > { %p1129_p10 = pnand %p1128_p7, %p1122_p11 }
  0x2b   : > { %1132 = shalt.err (!%p1129_p10)
}
  0x2c   : > { %s1218_s5 = smov 128   ;;  %s1219_s7 = smov 8  }
  0x2d   : > { %1041 = dma.hbm_to_vmem [thread:$0]  (!%p1321_p0), %s1315_s6, 1024, %s1317_s8, %s1326_s10, %s1218_s5, %s1218_s5, %s1219_s7  }
  0x2e   : > { %p175_p12 = scmp.lt.s32.totalorder %s1215_s17, 3  ;;  %p1461_p1 = scmp.ge.s32.totalorder %s1215_s17, 1 }
  0x30   : > { %p176_p3 = pnand %p1461_p1, %p175_p12 }
  0x31   : > { %s1358_s11 = sand.u32 (!%p176_p3), 1, %s1199_s13  }
  0x32   : > { %179 = sbr.rel (%p176_p3) target bundleno = 508 (0x1fc), region = 32  ;;  %s913_s18 = sshll.u32 (!%p176_p3), %s1358_s11, 6 }
  0x33   : > { %s182_s19 = scalar_lea.sflag (!%p176_p3), [#allocation3], %s1358_s11  ;;  %s185_s21 = scalar_lea.vmem (!%p176_p3), [#allocation2], %s913_s18 }
  0x39   : > { %1186 = dma.done.wait (%p1293_p8), %s182_s19, 1024  }
  0x3a   : > { %1188 = vsyncadd (%p1293_p8), %s182_s19, 4294966272  ;;  %v1220_v0 = vmov 0.0|0.0   ;;  %vm1221_vm0 = vmmov 0   ;;  %v1222_v1 = vmov 0.0   ;;  %v210_v2 = vld [vmem:[%s185_s21] sm:$0xff]  ;;  %v211_v3 = vld [vmem:[%s185_s21 + $0x8] sm:$0xff] }
  0x3b   : > { %1010 = vmatprep.subr.bf16.mxu0 %v1220_v0  ;;  %1013 = vmatprep.subr.bf16.mxu1 %v1220_v0  ;;  %v212_v4 = vld [vmem:[%s185_s21 + $0x10] sm:$0xff]  ;;  %v1011_v5 = vpack.c.bf16 %v211_v3, %v210_v2  ;;  %v213_v6 = vld [vmem:[%s185_s21 + $0x18] sm:$0xff]  ;;  %v214_v7 = vld [vmem:[%s185_s21 + $0x20] sm:$0xff]  ;;  %vm221_vm1 = vcmask 130048   ;;  %s914_s23 = sshll.u32 %s1358_s11, 5  ;;  %vm797_vm2 = vcmask 64512  }
  0x3c   : > { %958 = vmatprep.mubr.msk.f32.mxu0 %vm1221_vm0, %v1222_v1  ;;  %965 = vmatprep.mubr.msk.f32.mxu1 %vm1221_vm0, %v1222_v1  ;;  %v1014_v8 = vpack.c.bf16 %v213_v6, %v212_v4  ;;  %v215_v9 = vld [vmem:[%s185_s21 + $0x28] sm:$0xff]  ;;  %v216_v10 = vld [vmem:[%s185_s21 + $0x30] sm:$0xff]  ;;  %v217_v11 = vld [vmem:[%s185_s21 + $0x38] sm:$0xff]  ;;  %s207_s28 = scalar_lea.vmem [#allocation5], %s914_s23  ;;  %s929_s30 = sshll.u32 %s1207_s15, 9 }
  0x3d   : > { %1012 = vmatpush3.bf16.msra.mxu0 %v1011_v5  ;;  %v218_v12 = vld [vmem:[%s1452_s1] sm:$0xff]  ;;  %v1017_v13 = vpack.c.bf16 %v215_v9, %v214_v7  ;;  %v1020_v14 = vpack.c.bf16 %v217_v11, %v216_v10  ;;  %v220_v16 = vld [vmem:[%s1453_s2 + $0x8] sm:$0xff]  ;;  %s818_s29 = sshll.u32 %s207_s28, 4  ;;  %s1400_s7 = scalar_lea.hbm %s1454_s3, %s929_s30  ;;  %s1394_s29 = int_to_ptr.vmem [resolvable:$true] %s818_s29 }
  0x3e   : > { %1015 = vmatpush3.bf16.msra.mxu1 %v1014_v8  ;;  %1016 = vmatprep.subr.bf16.mxu0 %v1220_v0  ;;  %v219_v15 = vld [vmem:[%s1453_s2] sm:$0xff]  ;;  %s803_s15 = scalar_lea.sflag [#allocation4], %s1358_s11  ;;  %s1133_s18 = scalar_lea.vmem %s1394_s29, 512 }
  0x3f   : > { %1019 = vmatprep.subr.bf16.mxu1 %v1220_v0  ;;  %v1023_v17 = vpack.c.bf16 %v220_v16, %v219_v15  ;;  %p1134_p8 = scmp.ne.s32.totalorder %s1394_s29, %s1133_s18  ;;  %p1462_p9 = scmp.ne.s32.totalorder %s1458_s25, 0 }
  0x40   : > { %959 = vmatmul.mubr.msk.f32.vlgmr.msra.gmra.mrb[0].mxu0 %vm221_vm1, %v218_v12  ;;  %s1223_s19 = smov [#allocation5]  }
  0x41   : > { %966 = vmatmul.mubr.msk.f32.vlgmr.msra.gmra.mrb[0].mxu1 %vm221_vm1, %v218_v12  ;;  %1018 = vmatpush3.bf16.msra.mxu0 %v1017_v13  ;;  %p1135_p11 = pnand %p1134_p8, %p1462_p9  ;;  %s1137_s21 = sshll.u32 %s1223_s19, 4  ;;  %s1138_s21 = int_to_ptr.vmem [resolvable:$false] %s1137_s21 }
  0x42   : > { %1021 = vmatpush3.bf16.msra.mxu1 %v1020_v14  ;;  %972 = vmatprep.mubr.msk.f32.mxu0 %vm1221_vm0, %v1222_v1  ;;  %s1139_s24 = scalar_lea.vmem %s1138_s21, 1024  ;;  %p1140_p6 = scmp.lt.s32.totalorder %s1394_s29, %s1138_s21 }
  0x43   : > { %979 = vmatprep.mubr.msk.f32.mxu1 %vm1221_vm0, %v1222_v1  ;;  %1022 = vmatprep.subr.bf16.mxu0 %v1220_v0  ;;  %p1136_p0 = pneg %p1135_p11  ;;  %p1141_p13 = scmp.lt.s32.totalorder %s1139_s24, %s1133_s18 }
  0x44   : > { %973 = vmatmul.mubr.msk.f32.vlgmr.msra.gmra.mrb[2].mxu0 %vm221_vm1, %v218_v12  ;;  %1025 = vmatprep.subr.bf16.mxu1 %v1220_v0 }
  0x45   : > { %980 = vmatmul.mubr.msk.f32.vlgmr.msra.gmra.mrb[2].mxu1 %vm221_vm1, %v218_v12  ;;  %1024 = vmatpush3.bf16.msra.mxu0 %v1023_v17  ;;  %p1142_p2 = por %p1141_p13, %p1140_p6 }
  0x46   : > { %1027 = vmatpush3.bf16.msra.mxu1 %v1023_v17  ;;  %986 = vmatprep.mubr.msk.f32.mxu0 %vm1221_vm0, %v1222_v1 }
  0x47   : > { %993 = vmatprep.mubr.msk.f32.mxu1 %vm1221_vm0, %v1222_v1  ;;  %1028 = vmatprep.subr.bf16.mxu0 %v1220_v0  ;;  %p1143_p5 = pnand %p1142_p2, %p1136_p0 }
  0x48   : > { %1031 = vmatprep.subr.bf16.mxu1 %v1220_v0 }
 0x113   : > { %v291_v18 = vpop.f32.mrb[0].mxu0 }
 0x114   : > { %v361_v19 = vpop.f32.mrb[0].mxu1  ;;  %v960_v20 = vpop.f32.mrb[1].mxu0  ;;  %987 = vmatmul.mubr.msk.f32.vlgmr.msra.gmra.mrb[4].mxu0 %vm221_vm1, %v291_v18 }
 0x115   : > { %v967_v21 = vpop.f32.mrb[1].mxu1  ;;  %994 = vmatmul.mubr.msk.f32.vlgmr.msra.gmra.mrb[4].mxu1 %vm221_vm1, %v361_v19  ;;  %1030 = vmatpush3.bf16.msra.mxu0 %v1023_v17 }
 0x116   : > { %1033 = vmatpush3.bf16.msra.mxu1 %v1023_v17  ;;  %1000 = vmatprep.mubr.msk.f32.mxu0 %vm1221_vm0, %v1222_v1 }
 0x117   : > { %v431_v22 = vpop.f32.mrb[2].mxu0  ;;  %1007 = vmatprep.mubr.msk.f32.mxu1 %vm1221_vm0, %v1222_v1 }
 0x118   : > { %v501_v23 = vpop.f32.mrb[2].mxu1  ;;  %v974_v24 = vpop.f32.mrb[3].mxu0  ;;  %1001 = vmatmul.mubr.msk.f32.vlgmr.msra.gmra.mrb[6].mxu0 %vm221_vm1, %v431_v22 }
 0x119   : > { %v981_v25 = vpop.f32.mrb[3].mxu1  ;;  %1008 = vmatmul.mubr.msk.f32.vlgmr.msra.gmra.mrb[6].mxu1 %vm221_vm1, %v501_v23 }
 0x1e7   : > { %v574_v26 = vpop.f32.mrb[4].mxu0 }
 0x1e8   : > { %798 = vst.msk [vmem:[%s207_s28] sm:$0xff] %vm797_vm2, %v574_v26  ;;  %v647_v27 = vpop.f32.mrb[4].mxu1  ;;  %v988_v28 = vpop.f32.mrb[5].mxu0 }
 0x1e9   : > { %799 = vst.msk [vmem:[%s207_s28 + $0x8] sm:$0xff] %vm797_vm2, %v647_v27  ;;  %v995_v29 = vpop.f32.mrb[5].mxu1 }
 0x1eb   : > { %v720_v30 = vpop.f32.mrb[6].mxu0 }
 0x1ec   : > { %800 = vst.msk [vmem:[%s207_s28 + $0x10] sm:$0xff] %vm797_vm2, %v720_v30  ;;  %v793_v31 = vpop.f32.mrb[6].mxu1  ;;  %v1002_v32 = vpop.f32.mrb[7].mxu0 }
 0x1ed   : > { %801 = vst.msk [vmem:[%s207_s28 + $0x18] sm:$0xff] %vm797_vm2, %v793_v31  ;;  %v1009_v33 = vpop.f32.mrb[7].mxu1 }
 0x1ee   : > { %1146 = shalt.err (!%p1143_p5)
}
 0x1ef   : > { %s1147_s6 = scalar_lea.hbm %s1400_s7, 512  ;;  %s1151_s10 = scalar_lea.hbm %s1454_s3, 1024 }
 0x1f0   : > { %p1148_p4 = scmp.ne.s32.totalorder %s1400_s7, %s1147_s6  ;;  %p1152_p12 = scmp.lt.u32.totalorder %s1400_s7, %s1454_s3 }
 0x1f1   : > { %p1153_p1 = scmp.lt.u32.totalorder %s1151_s10, %s1147_s6  ;;  %p1155_p8 = scmp.lt.u32.totalorder %s1147_s6, %s1400_s7 }
 0x1f2   : > { %p1149_p7 = pnand %p1148_p4, %p1462_p9 }
 0x1f3   : > { %p1154_p3 = por %p1153_p1, %p1152_p12 }
 0x1f4   : > { %p1150_p10 = pneg %p1149_p7 }
 0x1f5   : > { %p1156_p11 = por %p1155_p8, %p1154_p3 }
 0x1f7   : > { %p1157_p0 = pnand %p1156_p11, %p1150_p10 }
 0x1f9   : > { %1160 = shalt.err (!%p1157_p0)
}
 0x1fa   : > { %s1224_s28 = smov 128   ;;  %s1225_s30 = smov 8  }
 0x1fb   : > { %1036 = dma.vmem_to_hbm [thread:$0]  (%p1462_p9), %s1394_s29, 512, %s1400_s7, %s803_s15, %s1224_s28, %s1224_s28, %s1225_s30  }
 0x1fc PF: > { %s833_s4 = sand.u32 1, %s1195_s12   ;;  %p1463_p6 = scmp.ne.s32.totalorder %s1459_s27, 0 }
 0x1fd   : > { %p1464_p13 = scmp.ge.s32.totalorder %s1215_s17, 2  ;;  %s834_s5 = scalar_lea.sflag [#allocation4], %s833_s4 }
 0x1ff   : > { %p1043_p2 = pnand %p1464_p13, %p1463_p6 }
 0x201   : > { %1190 = dma.done.wait (!%p1043_p2), %s834_s5, 512  }
 0x202   : > { %1192 = vsyncadd (!%p1043_p2), %s834_s5, 4294966784  ;;  %s19_s17 = sadd.s32 1, %s1215_s17   ;;  %s1465_s12 = smov %s1199_s13 }
 0x203   : > { %p16_p5 = scmp.ge.s32.totalorder %s19_s17, 4   ;;  %s1466_s13 = smov %s1203_s14 }
 0x204   : > { %s1467_s14 = smov %s1302_s26  ;;  %s1468_s15 = smov %s1211_s16 }
 0x205   : > { %s1469_s16 = smov %s1471_s20  ;;  %18 = sbr.rel (!%p16_p5) target bundleno = 6 (0x6), region = 77 }
 0x20c   :  { %839 = vsyncpa [#allocation3], 1 }
 0x20d   :  { %841 = vsyncpa [#allocation3 + $0x1], 1 }
 0x20e   :  { %842 = vsyncpa [#allocation4], 1 }
 0x20f   :  { %844 = vsyncpa [#allocation4 + $0x1], 1 }

</bundles_post_ra>
